<compile_context>
chip_gen: v7x
topology: tpu7x:2x2x1
jax: 0.10.0
libtpu: 0.0.40
codegen_flags: <defaults>
</compile_context>

<pallas_src>
import functools
import math

import jax
import jax.numpy as jnp
from jax.experimental import pallas as pl
from jax.experimental.pallas import tpu as pltpu


def _flash_sdpa_kernel(*refs, has_bias):
    """Blocks: bias (1, tkv) [optional]; q/o (hg, tq, D); k/v (hg, tkv, D)."""
    if has_bias:
        bias_ref, q_ref, k_ref, v_ref, o_ref, m_sc, l_sc, acc_sc = refs
    else:
        q_ref, k_ref, v_ref, o_ref, m_sc, l_sc, acc_sc = refs

    kv_idx = pl.program_id(3)

    @pl.when(kv_idx == 0)
    def _():
        m_sc[...] = jnp.full(m_sc.shape, -jnp.inf, dtype=jnp.float32)
        l_sc[...] = jnp.zeros(l_sc.shape, dtype=jnp.float32)
        acc_sc[...] = jnp.zeros(acc_sc.shape, dtype=jnp.float32)

    d_tensor = q_ref.shape[-1]
    # Fold 1/sqrt(d) into the small (hg, tq, D) q tile instead of the
    # (hg, tq, tkv) scores.  Keep the native dtype so bf16 inputs stay bf16
    # on the MXU path.
    scale = jnp.asarray(1.0 / math.sqrt(d_tensor), dtype=q_ref.dtype)
    q = q_ref[...] * scale                                   # (hg, tq, D)

    # scores = q @ k^T per head; batched dot_general contracts D directly
    # (no explicit k.T / XLU transpose), f32 accumulation on the MXU.
    s = jnp.einsum("hqd,hkd->hqk", q, k_ref[...],
                   preferred_element_type=jnp.float32)       # (hg, tq, tkv)
    if has_bias:
        s = s + bias_ref[...]                                # additive mask bias

    # Online (flash) softmax update.
    m_prev = m_sc[...]                                       # (hg, tq, 1)
    m_new = jnp.maximum(m_prev, jnp.max(s, axis=-1, keepdims=True))
    alpha = jnp.exp(m_prev - m_new)
    p = jnp.exp(s - m_new)                                   # (hg, tq, tkv) f32
    l_sc[...] = alpha * l_sc[...] + jnp.sum(p, axis=-1, keepdims=True)
    pv = jnp.einsum("hqk,hkd->hqd", p.astype(v_ref.dtype), v_ref[...],
                    preferred_element_type=jnp.float32)      # (hg, tq, D)
    acc_sc[...] = alpha * acc_sc[...] + pv
    m_sc[...] = m_new

    @pl.when(kv_idx == pl.num_programs(3) - 1)
    def _():
        # Normalize the small (tq, D) output (not the (tq, tkv) probs);
        # approx reciprocal runs on the otherwise-idle EUP slot.
        inv_l = pl.reciprocal(l_sc[...], approx=True)
        o_ref[...] = (acc_sc[...] * inv_l).astype(o_ref.dtype)


def _pick_tile(n, cap):
    """Full extent if it fits the cap, else the largest 128-multiple divisor."""
    if n <= cap:
        return n
    for t in range(cap, 127, -1):
        if n % t == 0 and t % 128 == 0:
            return t
    return n


def _pick_head_group(n_head, tq, tkv, d, itemsize):
    """Largest divisor of n_head keeping the per-step working set ~<= 8 MiB
    (fits default scoped VMEM on v5e/v6e and v7x's smaller 64 MiB VMEM with
    double-buffered K/V tiles)."""
    budget = 8 * 1024 * 1024

    def cost(hg):
        scores = 2 * hg * tq * tkv * 4                  # s + p (f32)
        kv = 2 * 2 * hg * tkv * d * itemsize            # k, v (double-buffered)
        q_o = (2 + 2) * hg * tq * d * itemsize          # q + out (double-buffered)
        acc = hg * tq * d * 4
        return scores + kv + q_o + acc

    hg = n_head
    while hg > 1 and cost(hg) > budget:
        hg -= 1
        while n_head % hg:
            hg -= 1
    return hg


def scaled_dot_product_attention(query, key, value, attention_mask=None):
    """query/key/value: [B, H, L, D]; attention_mask: [B, L] int (or None)."""
    B, H, L, D = query.shape
    has_bias = attention_mask is not None

    tq = _pick_tile(L, 256)
    tkv = _pick_tile(L, 512)
    hg = _pick_head_group(H, tq, tkv, D, query.dtype.itemsize)

    grid = (B, H // hg, L // tq, L // tkv)

    qo_spec = pl.BlockSpec((pl.Squeezed(), hg, tq, D),
                           lambda b, h, qi, ki: (b, h, qi, 0))
    kv_spec = pl.BlockSpec((pl.Squeezed(), hg, tkv, D),
                           lambda b, h, qi, ki: (b, h, ki, 0))

    in_specs = [qo_spec, kv_spec, kv_spec]
    operands = [query, key, value]

    if has_bias:
        # Additive mask bias (computed once, outside the hot loop).
        # NOTE: for a row whose keys are ALL masked, masked_fill(-1e9)+softmax
        # gives (near-)uniform attention; the additive bias behaves the same
        # to within ~1e-9 relative score differences and the denominator never
        # hits 0 (finite bias).
        bias = (-1e9) * (1.0 - attention_mask.astype(jnp.float32))
        bias = bias.reshape(B, 1, L)
        bias_spec = pl.BlockSpec((pl.Squeezed(), 1, tkv),
                                 lambda b, h, qi, ki: (b, 0, ki))
        in_specs = [bias_spec] + in_specs
        operands = [bias] + operands

    kernel = functools.partial(_flash_sdpa_kernel, has_bias=has_bias)

    return pl.pallas_call(
        kernel,
        out_shape=jax.ShapeDtypeStruct((B, H, L, D), query.dtype),
        grid_spec=pltpu.PrefetchScalarGridSpec(
            num_scalar_prefetch=0,
            grid=grid,
            in_specs=in_specs,
            out_specs=qo_spec,
            scratch_shapes=[
                pltpu.VMEM((hg, tq, 1), jnp.float32),   # running max m
                pltpu.VMEM((hg, tq, 1), jnp.float32),   # running denom l
                pltpu.VMEM((hg, tq, D), jnp.float32),   # output accumulator
            ],
        ),
        compiler_params=pltpu.CompilerParams(
            # batch / head-group / q-tile are independent (megacore-shardable
            # on v7x); kv-tile carries the online-softmax state -> arbitrary.
            dimension_semantics=("parallel", "parallel", "parallel", "arbitrary"),
            # Headroom over the scoped-VMEM default; the head-group heuristic
            # targets an ~8 MiB working set so this always fits (v5e..v7x).
            vmem_limit_bytes=64 * 1024 * 1024,
        ),
    )(*operands)


def _reference(query, key, value, attention_mask):
    d = query.shape[-1]
    scores = jnp.einsum("bhqd,bhkd->bhqk", query, key) / math.sqrt(d)
    if attention_mask is not None:
        m = attention_mask[:, None, None, :]
        scores = jnp.where(m == 0, -1e9, scores)
    attn = jax.nn.softmax(scores, axis=-1)
    return jnp.einsum("bhqk,bhkd->bhqd", attn, value)


if __name__ == "__main__":
    # TODO(synk): dropout_p is accepted by the PyTorch module but never applied
    # in its forward, so there is nothing to implement for it.
    B, H, L, D = 2, 4, 8, 32
    key0 = jax.random.PRNGKey(0)
    kq, kk, kv, km = jax.random.split(key0, 4)

    query = jax.random.normal(kq, (B, H, L, D), dtype=jnp.float32)
    key_ = jax.random.normal(kk, (B, H, L, D), dtype=jnp.float32)
    value = jax.random.normal(kv, (B, H, L, D), dtype=jnp.float32)
    # random 0/1 padding-style mask over key positions; keep position 0 valid
    # so no row is fully masked.
    mask = (jax.random.uniform(km, (B, L)) > 0.3).astype(jnp.int32)
    mask = mask.at[:, 0].set(1)

    # float32 path with mask
    out = scaled_dot_product_attention(query, key_, value, mask)
    out = jax.block_until_ready(out)
    ref = _reference(query, key_, value, mask)
    assert out.shape == (B, H, L, D)
    assert jnp.allclose(out, ref, atol=5e-3, rtol=5e-3), "f32 mismatch vs reference"

    # float32 path without mask (bias-free kernel variant)
    out_nm = scaled_dot_product_attention(query, key_, value, None)
    out_nm = jax.block_until_ready(out_nm)
    ref_nm = _reference(query, key_, value, None)
    assert jnp.allclose(out_nm, ref_nm, atol=5e-3, rtol=5e-3), \
        "f32 (no mask) mismatch vs reference"

    # bf16 path (native bf16 feeds the MXU, f32 accumulation via
    # preferred_element_type; output comes back as bf16)
    q_bf, k_bf, v_bf = (x.astype(jnp.bfloat16) for x in (query, key_, value))
    out_bf = scaled_dot_product_attention(q_bf, k_bf, v_bf, mask)
    out_bf = jax.block_until_ready(out_bf)
    ref_bf = _reference(q_bf.astype(jnp.float32), k_bf.astype(jnp.float32),
                        v_bf.astype(jnp.float32), mask)
    assert out_bf.dtype == jnp.bfloat16
    assert jnp.allclose(out_bf.astype(jnp.float32), ref_bf, atol=3e-2, rtol=3e-2), \
        "bf16 mismatch vs reference"

    print("KERNEL_OK")
</pallas_src>

<mosaic_0001>
module attributes {stable_mosaic.version = 11 : i64} {
  func.func @_flash_sdpa_kernel(%arg0: i32, %arg1: i32, %arg2: i32, %arg3: i32, %arg4: memref<1x1x8xf32, #tpu.memory_space<vmem>>, %arg5: memref<1x4x8x32xf32, #tpu.memory_space<vmem>>, %arg6: memref<1x4x8x32xf32, #tpu.memory_space<vmem>>, %arg7: memref<1x4x8x32xf32, #tpu.memory_space<vmem>>, %arg8: memref<1x4x8x32xf32, #tpu.memory_space<vmem>>, %arg9: memref<4x8x1xf32, #tpu.memory_space<vmem>>, %arg10: memref<4x8x1xf32, #tpu.memory_space<vmem>>, %arg11: memref<4x8x32xf32, #tpu.memory_space<vmem>>) attributes {dimension_semantics = [#tpu.dimension_semantics<parallel>, #tpu.dimension_semantics<parallel>, #tpu.dimension_semantics<parallel>, #tpu.dimension_semantics<arbitrary>], iteration_bounds = array<i64: 2, 1, 1, 1>, scalar_prefetch = 0 : i64, scratch_operands = 3 : i64, tpu.core_type = #tpu.core_type<tc>, window_params = [{transform_indices = @transform_0, window_bounds = array<i64: 1, 1, 8>}, {transform_indices = @transform_1, window_bounds = array<i64: 1, 4, 8, 32>}, {transform_indices = @transform_2, window_bounds = array<i64: 1, 4, 8, 32>}, {transform_indices = @transform_3, window_bounds = array<i64: 1, 4, 8, 32>}, {transform_indices = @transform_4, window_bounds = array<i64: 1, 4, 8, 32>}]} {
    %c0_i32 = arith.constant 0 : i32
    %0 = arith.cmpi eq, %arg3, %c0_i32 : i32
    %1 = arith.extui %0 : i1 to i32
    %c0_i32_0 = arith.constant 0 : i32
    %2 = arith.cmpi ne, %1, %c0_i32_0 : i32
    scf.if %2 {
      %cst_39 = arith.constant 0xFF800000 : f32
      %42 = vector.broadcast %cst_39 : f32 to vector<4x8x1xf32>
      %c0_40 = arith.constant 0 : index
      %c0_41 = arith.constant 0 : index
      %c0_42 = arith.constant 0 : index
      %43 = vector.load %arg9[%c0_40, %c0_41, %c0_42] : memref<4x8x1xf32, #tpu.memory_space<vmem>>, vector<4x8x1xf32>
      tpu.vector_store %arg9[%c0_40, %c0_41, %c0_42], %42 {strides = array<i32>} : memref<4x8x1xf32, #tpu.memory_space<vmem>>, vector<4x8x1xf32>,
      %cst_43 = arith.constant 0.000000e+00 : f32
      %44 = vector.broadcast %cst_43 : f32 to vector<4x8x1xf32>
      %c0_44 = arith.constant 0 : index
      %c0_45 = arith.constant 0 : index
      %c0_46 = arith.constant 0 : index
      %45 = vector.load %arg10[%c0_44, %c0_45, %c0_46] : memref<4x8x1xf32, #tpu.memory_space<vmem>>, vector<4x8x1xf32>
      tpu.vector_store %arg10[%c0_44, %c0_45, %c0_46], %44 {strides = array<i32>} : memref<4x8x1xf32, #tpu.memory_space<vmem>>, vector<4x8x1xf32>,
      %cst_47 = arith.constant 0.000000e+00 : f32
      %46 = vector.broadcast %cst_47 : f32 to vector<4x8x32xf32>
      %c0_48 = arith.constant 0 : index
      %c0_49 = arith.constant 0 : index
      %c0_50 = arith.constant 0 : index
      %47 = vector.load %arg11[%c0_48, %c0_49, %c0_50] : memref<4x8x32xf32, #tpu.memory_space<vmem>>, vector<4x8x32xf32>
      tpu.vector_store %arg11[%c0_48, %c0_49, %c0_50], %46 {strides = array<i32>} : memref<4x8x32xf32, #tpu.memory_space<vmem>>, vector<4x8x32xf32>,
    } else {
    }
    %c0 = arith.constant 0 : index
    %c0_1 = arith.constant 0 : index
    %c0_2 = arith.constant 0 : index
    %c0_3 = arith.constant 0 : index
    %3 = vector.load %arg5[%c0, %c0_1, %c0_2, %c0_3] : memref<1x4x8x32xf32, #tpu.memory_space<vmem>>, vector<1x4x8x32xf32>
    %4 = vector.shape_cast %3 : vector<1x4x8x32xf32> to vector<4x8x32xf32>
    %cst = arith.constant 0.176776692 : f32
    %5 = vector.broadcast %cst : f32 to vector<4x8x32xf32>
    %6 = arith.mulf %4, %5 : vector<4x8x32xf32>
    %c0_4 = arith.constant 0 : index
    %c0_5 = arith.constant 0 : index
    %c0_6 = arith.constant 0 : index
    %c0_7 = arith.constant 0 : index
    %7 = vector.load %arg6[%c0_4, %c0_5, %c0_6, %c0_7] : memref<1x4x8x32xf32, #tpu.memory_space<vmem>>, vector<1x4x8x32xf32>
    %8 = vector.shape_cast %7 : vector<1x4x8x32xf32> to vector<4x8x32xf32>
    "tpu.trace_start"() <{level = 10 : i32, message = "hqd,hkd->hqk"}> : () -> ()
    %cst_8 = arith.constant dense<0.000000e+00> : vector<4x8x8xf32>
    %9 = tpu.matmul %6, %8, %cst_8 {dimension_numbers = #tpu.dot_dimension_numbers<[2], [2], [1], [1], [0, 0, 0, 1, 1, 1], [0], [0]>} : vector<4x8x32xf32>, vector<4x8x32xf32>, vector<4x8x8xf32> -> vector<4x8x8xf32>
    "tpu.trace_stop"() : () -> ()
    %c0_9 = arith.constant 0 : index
    %c0_10 = arith.constant 0 : index
    %c0_11 = arith.constant 0 : index
    %10 = vector.load %arg4[%c0_9, %c0_10, %c0_11] : memref<1x1x8xf32, #tpu.memory_space<vmem>>, vector<1x1x8xf32>
    %11 = vector.shape_cast %10 : vector<1x1x8xf32> to vector<1x8xf32>
    %12 = vector.shape_cast %11 : vector<1x8xf32> to vector<1x1x8xf32>
    %13 = vector.broadcast %12 : vector<1x1x8xf32> to vector<4x8x8xf32>
    %14 = arith.addf %9, %13 : vector<4x8x8xf32>
    %c0_12 = arith.constant 0 : index
    %c0_13 = arith.constant 0 : index
    %c0_14 = arith.constant 0 : index
    %15 = vector.load %arg9[%c0_12, %c0_13, %c0_14] : memref<4x8x1xf32, #tpu.memory_space<vmem>>, vector<4x8x1xf32>
    %cst_15 = arith.constant dense<0xFF800000> : vector<4x8xf32>
    %16 = vector.multi_reduction <maximumf>, %14, %cst_15 [2] : vector<4x8x8xf32> to vector<4x8xf32>
    %17 = vector.shape_cast %16 : vector<4x8xf32> to vector<4x8x1xf32>
    %18 = arith.maximumf %15, %17 : vector<4x8x1xf32>
    %19 = arith.subf %15, %18 : vector<4x8x1xf32>
    %20 = math.exp %19 : vector<4x8x1xf32>
    %21 = vector.broadcast %18 : vector<4x8x1xf32> to vector<4x8x8xf32>
    %22 = arith.subf %14, %21 : vector<4x8x8xf32>
    %23 = math.exp %22 : vector<4x8x8xf32>
    %c0_16 = arith.constant 0 : index
    %c0_17 = arith.constant 0 : index
    %c0_18 = arith.constant 0 : index
    %24 = vector.load %arg10[%c0_16, %c0_17, %c0_18] : memref<4x8x1xf32, #tpu.memory_space<vmem>>, vector<4x8x1xf32>
    %25 = arith.mulf %20, %24 : vector<4x8x1xf32>
    %cst_19 = arith.constant dense<0.000000e+00> : vector<4x8xf32>
    %26 = vector.multi_reduction <add>, %23, %cst_19 [2] : vector<4x8x8xf32> to vector<4x8xf32>
    %27 = vector.shape_cast %26 : vector<4x8xf32> to vector<4x8x1xf32>
    %28 = arith.addf %25, %27 : vector<4x8x1xf32>
    %c0_20 = arith.constant 0 : index
    %c0_21 = arith.constant 0 : index
    %c0_22 = arith.constant 0 : index
    %29 = vector.load %arg10[%c0_20, %c0_21, %c0_22] : memref<4x8x1xf32, #tpu.memory_space<vmem>>, vector<4x8x1xf32>
    tpu.vector_store %arg10[%c0_20, %c0_21, %c0_22], %28 {strides = array<i32>} : memref<4x8x1xf32, #tpu.memory_space<vmem>>, vector<4x8x1xf32>,
    %c0_23 = arith.constant 0 : index
    %c0_24 = arith.constant 0 : index
    %c0_25 = arith.constant 0 : index
    %c0_26 = arith.constant 0 : index
    %30 = vector.load %arg7[%c0_23, %c0_24, %c0_25, %c0_26] : memref<1x4x8x32xf32, #tpu.memory_space<vmem>>, vector<1x4x8x32xf32>
    %31 = vector.shape_cast %30 : vector<1x4x8x32xf32> to vector<4x8x32xf32>
    "tpu.trace_start"() <{level = 10 : i32, message = "hqk,hkd->hqd"}> : () -> ()
    %cst_27 = arith.constant dense<0.000000e+00> : vector<4x8x32xf32>
    %32 = tpu.matmul %23, %31, %cst_27 {dimension_numbers = #tpu.dot_dimension_numbers<[2], [1], [1], [2], [0, 0, 0, 1, 1, 2], [0], [0]>} : vector<4x8x8xf32>, vector<4x8x32xf32>, vector<4x8x32xf32> -> vector<4x8x32xf32>
    "tpu.trace_stop"() : () -> ()
    %c0_28 = arith.constant 0 : index
    %c0_29 = arith.constant 0 : index
    %c0_30 = arith.constant 0 : index
    %33 = vector.load %arg11[%c0_28, %c0_29, %c0_30] : memref<4x8x32xf32, #tpu.memory_space<vmem>>, vector<4x8x32xf32>
    %34 = vector.broadcast %20 : vector<4x8x1xf32> to vector<4x8x32xf32>
    %35 = arith.mulf %34, %33 : vector<4x8x32xf32>
    %36 = arith.addf %35, %32 : vector<4x8x32xf32>
    %c0_31 = arith.constant 0 : index
    %c0_32 = arith.constant 0 : index
    %c0_33 = arith.constant 0 : index
    %37 = vector.load %arg11[%c0_31, %c0_32, %c0_33] : memref<4x8x32xf32, #tpu.memory_space<vmem>>, vector<4x8x32xf32>
    tpu.vector_store %arg11[%c0_31, %c0_32, %c0_33], %36 {strides = array<i32>} : memref<4x8x32xf32, #tpu.memory_space<vmem>>, vector<4x8x32xf32>,
    %c0_34 = arith.constant 0 : index
    %c0_35 = arith.constant 0 : index
    %c0_36 = arith.constant 0 : index
    %38 = vector.load %arg9[%c0_34, %c0_35, %c0_36] : memref<4x8x1xf32, #tpu.memory_space<vmem>>, vector<4x8x1xf32>
    tpu.vector_store %arg9[%c0_34, %c0_35, %c0_36], %18 {strides = array<i32>} : memref<4x8x1xf32, #tpu.memory_space<vmem>>, vector<4x8x1xf32>,
    %c0_i32_37 = arith.constant 0 : i32
    %39 = arith.cmpi eq, %arg3, %c0_i32_37 : i32
    %40 = arith.extui %39 : i1 to i32
    %c0_i32_38 = arith.constant 0 : i32
    %41 = arith.cmpi ne, %40, %c0_i32_38 : i32
    scf.if %41 {
      %c0_39 = arith.constant 0 : index
      %c0_40 = arith.constant 0 : index
      %c0_41 = arith.constant 0 : index
      %42 = vector.load %arg10[%c0_39, %c0_40, %c0_41] : memref<4x8x1xf32, #tpu.memory_space<vmem>>, vector<4x8x1xf32>
      %43 = tpu.reciprocal %42 {approx = true} : vector<4x8x1xf32> -> vector<4x8x1xf32>
      %c0_42 = arith.constant 0 : index
      %c0_43 = arith.constant 0 : index
      %c0_44 = arith.constant 0 : index
      %44 = vector.load %arg11[%c0_42, %c0_43, %c0_44] : memref<4x8x32xf32, #tpu.memory_space<vmem>>, vector<4x8x32xf32>
      %45 = vector.broadcast %43 : vector<4x8x1xf32> to vector<4x8x32xf32>
      %46 = arith.mulf %44, %45 : vector<4x8x32xf32>
      %c0_45 = arith.constant 0 : index
      %c0_46 = arith.constant 0 : index
      %c0_47 = arith.constant 0 : index
      %c0_48 = arith.constant 0 : index
      %47 = vector.load %arg8[%c0_45, %c0_46, %c0_47, %c0_48] : memref<1x4x8x32xf32, #tpu.memory_space<vmem>>, vector<1x4x8x32xf32>
      %48 = vector.shape_cast %47 : vector<1x4x8x32xf32> to vector<4x8x32xf32>
      %49 = vector.shape_cast %46 : vector<4x8x32xf32> to vector<1x4x8x32xf32>
      tpu.vector_store %arg8[%c0_45, %c0_46, %c0_47, %c0_48], %49 {strides = array<i32>} : memref<1x4x8x32xf32, #tpu.memory_space<vmem>>, vector<1x4x8x32xf32>,
    } else {
    }
    return
  }
  func.func @transform_0(%arg0: i32, %arg1: i32, %arg2: i32, %arg3: i32) -> (i32, i32, i32) {
    %c0_i32 = arith.constant 0 : i32
    %c0_i32_0 = arith.constant 0 : i32
    return %arg0, %c0_i32, %arg3 : i32, i32, i32
  }
  func.func @transform_1(%arg0: i32, %arg1: i32, %arg2: i32, %arg3: i32) -> (i32, i32, i32, i32) {
    %c0_i32 = arith.constant 0 : i32
    %c0_i32_0 = arith.constant 0 : i32
    return %arg0, %arg1, %arg2, %c0_i32 : i32, i32, i32, i32
  }
  func.func @transform_2(%arg0: i32, %arg1: i32, %arg2: i32, %arg3: i32) -> (i32, i32, i32, i32) {
    %c0_i32 = arith.constant 0 : i32
    %c0_i32_0 = arith.constant 0 : i32
    return %arg0, %arg1, %arg3, %c0_i32 : i32, i32, i32, i32
  }
  func.func @transform_3(%arg0: i32, %arg1: i32, %arg2: i32, %arg3: i32) -> (i32, i32, i32, i32) {
    %c0_i32 = arith.constant 0 : i32
    %c0_i32_0 = arith.constant 0 : i32
    return %arg0, %arg1, %arg3, %c0_i32 : i32, i32, i32, i32
  }
  func.func @transform_4(%arg0: i32, %arg1: i32, %arg2: i32, %arg3: i32) -> (i32, i32, i32, i32) {
    %c0_i32 = arith.constant 0 : i32
    %c0_i32_0 = arith.constant 0 : i32
    return %arg0, %arg1, %arg2, %c0_i32 : i32, i32, i32, i32
  }
}

</mosaic_0001>

<bundles_post_ra>
// kernel: tpu_custom_call.1
= control target key start
LH: loop header
LB: loop body
LE: loop exit
PB: predicated region body
PF: predicated region fallthrough
CT: control target
= control target key end

     0   :  { %s2262_s0 = inlined_call_operand.hbm [shape: f32[2,1,8], index: 0, kind: input, shape index: {}]   ;;  %s2263_s1 = inlined_call_operand.hbm [shape: f32[2,4,8,32], index: 1, kind: input, shape index: {}]   ;;  %s2264_s2 = inlined_call_operand.hbm [shape: f32[2,4,8,32], index: 2, kind: input, shape index: {}]   ;;  %s2265_s3 = inlined_call_operand.hbm [shape: f32[2,4,8,32], index: 3, kind: input, shape index: {}]   ;;  %s2266_s4 = inlined_call_operand.hbm [shape: f32[2,4,8,32], index: 4, kind: output, shape index: {}]  }
   0x1   :  { %2278 = sst [smem:[#allocation22_spill]] %s2263_s1 }
   0x2   :  { %9 = vsyncpa [#allocation6], 0 }
   0x3   :  { %11 = vsyncpa [#allocation6 + $0x1], 0 }
   0x4   :  { %12 = vsyncpa [#allocation9], 0 }
   0x5   :  { %14 = vsyncpa [#allocation9 + $0x1], 0 }
   0x6   :  { %15 = vsyncpa [#allocation12], 0 }
   0x7   :  { %17 = vsyncpa [#allocation12 + $0x1], 0 }
   0x8   :  { %18 = vsyncpa [#allocation7], 0 }
   0x9   :  { %20 = vsyncpa [#allocation7 + $0x1], 0  ;;  %s1842_s15 = smov 0   ;;  %s1844_s16 = smov 0  }
   0xa   :  { %s1846_s17 = smov 0   ;;  %s1848_s18 = smov 0  }
   0xb   :  { %s1850_s19 = smov 0   ;;  %s1852_s20 = smov 0  }
   0xc LB: > { %2279 = sst [smem:[#allocation18_spill]] %s1790_s17  ;;  %s1873_s21 = sadd.s32 4294967295, %s1802_s20   ;;  %s1802_s20 = sphi %s1852_s20, %s26_s20   ;;  %s1798_s19 = sphi %s1850_s19, %s2302_s19   ;;  %s1794_s18 = sphi %s1848_s18, %s2301_s18   ;;  %s1790_s17 = sphi %s1846_s17, %s2300_s17   ;;  %s1786_s16 = sphi %s1844_s16, %s2304_s16   ;;  %s1782_s15 = sphi %s1842_s15, %s2303_s15  }
   0xd   : > { %2280 = sst [smem:[#allocation19_spill]] %s1798_s19  ;;  %s1385_s22 = sadd.s32 4294967294, %s1802_s20  }
   0xe   : > { %s52_s23 = sadd.s32 1, %s1798_s19  ;;  %s61_s24 = sadd.s32 1, %s1790_s17 }
   0xf   : > { %p54_p0 = scmp.ge.s32.totalorder %s52_s23, 2  ;;  %p68_p1 = scmp.ne.s32.totalorder %s1790_s17, %s1786_s16 }
  0x10   : > { %p69_p2 = scmp.eq.s32.totalorder %s1802_s20, 0  ;;  %p74_p3 = scmp.ne.s32.totalorder %s1786_s16, %s1782_s15 }
  0x11   : > { %s2306_s23 = smov (%p54_p0, %s52_s23), 0  ;;  %p75_p5 = scmp.eq.s32.totalorder %s1873_s21, 0 }
  0x12   : > { %2281 = sst [smem:[#allocation20_spill]] %s2306_s23  ;;  %p1885_p4 = por %p69_p2, %p68_p1 }
  0x13   : > { %s56_s26 = ssub.s32 %s1798_s19, %s2306_s23  ;;  %p192_p6 = scmp.eq.s32.totalorder %s1873_s21, 1 }
  0x14   : > { %p59_p7 = scmp.eq.s32.totalorder %s56_s26, 0  ;;  %p1893_p8 = por %p75_p5, %p74_p3 }
  0x15   : > { %p1897_p9 = por %p192_p6, %p68_p1  ;;  %p198_p10 = scmp.eq.s32.totalorder %s1385_s22, 1 }
  0x16   : > { %s2283_s27 = scalar_select %p1893_p8, 1, 0 }
  0x17   : > { %s2284_s28 = scalar_select %p1897_p9, 1, 0 }
  0x18   : > { %s1902_s29 = scalar_select %p59_p7, %s1790_s17, %s61_s24  }
  0x19   : > { %p1904_p11 = por %p198_p10, %p74_p3  ;;  %p1508_p13 = scmp.lt.s32.totalorder %s1802_s20, 2 }
  0x1a   : > { %2285 = sst [smem:[#allocation21_spill]] %s1902_s29  ;;  %s1911_s5 = sand.u32 1, %s1790_s17  }
  0x1b   : > { %s2286_s30 = scalar_select %p1904_p11, 1, 0 }
  0x1c   : > { %s236_s6 = sand.u32 1, %s1802_s20   ;;  %s1915_s7 = sshll.u32 %s1911_s5, 5 }
  0x1d   : > { %p1919_p0 = pnand %p1508_p13, %p1885_p4  ;;  %s1924_s9 = sshll.u32 %s1798_s19, 9 }
  0x1e   : > { %s2288_s1 = sld [smem:[#allocation22_spill]]  ;;  %s240_s13 = scalar_lea.vmem [#allocation8], %s1915_s7 }
  0x1f   : > { %s2287_s8 = scalar_select %p1919_p0, 1, 0 }
  0x20   : > { %s250_s14 = sshll.u32 %s240_s13, 4  ;;  %s1935_s22 = scalar_lea.sflag [#allocation9], %s236_s6  ;;  %s1933_s14 = int_to_ptr.vmem [resolvable:$true] %s250_s14 }
  0x21   : > { %p1941_p2 = pneg %p1919_p0 }
  0x24   : > { %s1930_s12 = scalar_lea.hbm %s2288_s1, %s1924_s9  ;;  %s1597_s11 = scalar_lea.hbm %s2288_s1, 1024 }
  0x25   : > { %s1592_s24 = scalar_lea.hbm %s1930_s12, 512  ;;  %p1598_p5 = scmp.lt.u32.totalorder %s1930_s12, %s2288_s1 }
  0x26   : > { %p1593_p1 = scmp.ne.s32.totalorder %s1930_s12, %s1592_s24  ;;  %p1599_p6 = scmp.lt.u32.totalorder %s1597_s11, %s1592_s24 }
  0x27   : > { %p1601_p10 = scmp.lt.u32.totalorder %s1592_s24, %s1930_s12 }
  0x28   : > { %p1595_p3 = pnand %p1941_p2, %p1593_p1  ;;  %p1600_p7 = por %p1599_p6, %p1598_p5 }
  0x2a   : > { %p1596_p4 = pneg %p1595_p3  ;;  %p1602_p13 = por %p1601_p10, %p1600_p7 }
  0x2c   : > { %p1603_p12 = pnand %p1602_p13, %p1596_p4 }
  0x2e   : > { %1606 = shalt.err (!%p1603_p12)
}
  0x2f   : > { %s1607_s6 = scalar_lea.vmem %s1933_s14, 512  ;;  %s1804_s26 = smov [#allocation8]  }
  0x30   : > { %p1608_p1 = scmp.ne.s32.totalorder %s1933_s14, %s1607_s6  ;;  %s1612_s10 = sshll.u32 %s1804_s26, 4  ;;  %s1613_s10 = int_to_ptr.vmem [resolvable:$false] %s1612_s10 }
  0x31   : > { %s1614_s23 = scalar_lea.vmem %s1613_s10, 1024  ;;  %p1615_p9 = scmp.lt.s32.totalorder %s1933_s14, %s1613_s10 }
  0x32   : > { %p1610_p3 = pnand %p1608_p1, %p1941_p2  ;;  %p1616_p8 = scmp.lt.s32.totalorder %s1614_s23, %s1607_s6 }
  0x34   : > { %p1611_p11 = pneg %p1610_p3  ;;  %p1617_p5 = por %p1616_p8, %p1615_p9 }
  0x36   : > { %p1618_p6 = pnand %p1617_p5, %p1611_p11 }
  0x38   : > { %1621 = shalt.err (!%p1618_p6)
}
  0x39   : > { %s2270_s24 = smov 128   ;;  %s2272_s11 = smov 8  }
  0x3a   : > { %1497 = dma.hbm_to_vmem [thread:$0]  (!%p1919_p0), %s1930_s12, 512, %s1933_s14, %s1935_s22, %s2270_s24, %s2270_s24, %s2272_s11  }
  0x3b   : > { %p1398_p8 = scmp.ge.s32.totalorder %s1802_s20, 1  ;;  %p306_p9 = scmp.lt.s32.totalorder %s1802_s20, 3 }
  0x3c   : > { %s1388_s6 = sshll.u32 %s1798_s19, 4  ;;  %s221_s1 = scalar_lea.vmem [#allocation5], %s1911_s5 }
  0x3d   : > { %p1970_p11 = pnand %p1398_p8, %p306_p9  ;;  %s1978_s23 = scalar_lea.hbm %s2262_s0, %s1388_s6 }
  0x3e   : > { %s229_s29 = sshll.u32 %s221_s1, 4  ;;  %s219_s12 = scalar_lea.sflag [#allocation6], %s1911_s5  ;;  %s230_s29 = int_to_ptr.vmem [resolvable:$true] %s229_s29 }
  0x3f   : > { %s2290_s13 = scalar_select %p1970_p11, 1, 0 }
  0x40   : > { %s1622_s14 = scalar_lea.hbm %s1978_s23, 16  ;;  %s1627_s19 = scalar_lea.hbm %s2262_s0, 32 }
  0x41   : > { %p1623_p12 = scmp.ne.s32.totalorder %s1978_s23, %s1622_s14  ;;  %p1628_p10 = scmp.lt.u32.totalorder %s1978_s23, %s2262_s0 }
  0x42   : > { %p1629_p13 = scmp.lt.u32.totalorder %s1627_s19, %s1622_s14  ;;  %p1631_p3 = scmp.lt.u32.totalorder %s1622_s14, %s1978_s23 }
  0x43   : > { %p1625_p4 = pnand %p1623_p12, %p1941_p2 }
  0x44   : > { %p1630_p1 = por %p1629_p13, %p1628_p10 }
  0x45   : > { %p1626_p7 = pneg %p1625_p4 }
  0x46   : > { %p1632_p5 = por %p1631_p3, %p1630_p1 }
  0x48   : > { %p1633_p6 = pnand %p1632_p5, %p1626_p7 }
  0x4a   : > { %1636 = shalt.err (!%p1633_p6)
}
  0x4b   : > { %s1637_s1 = scalar_lea.vmem %s230_s29, 16  ;;  %s1807_s10 = smov [#allocation5]  }
  0x4c   : > { %p1638_p8 = scmp.ne.s32.totalorder %s230_s29, %s1637_s1  ;;  %s1642_s17 = sshll.u32 %s1807_s10, 4  ;;  %s1643_s17 = int_to_ptr.vmem [resolvable:$false] %s1642_s17 }
  0x4d   : > { %s1644_s24 = scalar_lea.vmem %s1643_s17, 32  ;;  %p1645_p4 = scmp.lt.s32.totalorder %s230_s29, %s1643_s17 }
  0x4e   : > { %p1640_p9 = pnand %p1638_p8, %p1941_p2  ;;  %p1646_p11 = scmp.lt.s32.totalorder %s1644_s24, %s1637_s1 }
  0x50   : > { %p1641_p12 = pneg %p1640_p9  ;;  %p1647_p0 = por %p1646_p11, %p1645_p4 }
  0x52   : > { %p1648_p10 = pnand %p1647_p0, %p1641_p12 }
  0x54   : > { %1651 = shalt.err (!%p1648_p10)
}
  0x55   : > { %p2291_p13 = scmp.ne.s32.totalorder %s2287_s8, 0  ;;  %s2003_s14 = scalar_lea.hbm %s2264_s2, %s1924_s9 }
  0x56   : > { %s264_s17 = scalar_lea.vmem [#allocation10], %s1915_s7  ;;  %s1652_s6 = scalar_lea.hbm %s2003_s14, 512 }
  0x57   : > { %1494 = dma.hbm_to_vmem [thread:$0]  (!%p2291_p13), %s1978_s23, 16, %s230_s29, %s219_s12  }
  0x58   : > { %s274_s26 = sshll.u32 %s264_s17, 4  ;;  %p1653_p0 = scmp.ne.s32.totalorder %s2003_s14, %s1652_s6  ;;  %s2006_s26 = int_to_ptr.vmem [resolvable:$true] %s274_s26 }
  0x59   : > { %s1657_s23 = scalar_lea.hbm %s2264_s2, 1024  ;;  %p1658_p1 = scmp.lt.u32.totalorder %s2003_s14, %s2264_s2 }
  0x5a   : > { %p1655_p11 = pnand %p1653_p0, %p1941_p2  ;;  %p1659_p3 = scmp.lt.u32.totalorder %s1657_s23, %s1652_s6 }
  0x5b   : > { %p1661_p6 = scmp.lt.u32.totalorder %s1652_s6, %s2003_s14 }
  0x5c   : > { %p1656_p7 = pneg %p1655_p11  ;;  %p1660_p5 = por %p1659_p3, %p1658_p1 }
  0x5e   : > { %p1662_p8 = por %p1661_p6, %p1660_p5 }
  0x60   : > { %p1663_p9 = pnand %p1662_p8, %p1656_p7 }
  0x62   : > { %1666 = shalt.err (!%p1663_p9)
}
  0x63   : > { %s1667_s24 = scalar_lea.vmem %s2006_s26, 512  ;;  %s1808_s19 = smov [#allocation10]  }
  0x64   : > { %p1668_p12 = scmp.ne.s32.totalorder %s2006_s26, %s1667_s24  ;;  %s1672_s11 = sshll.u32 %s1808_s19, 4  ;;  %s1673_s11 = int_to_ptr.vmem [resolvable:$false] %s1672_s11 }
  0x65   : > { %s1674_s17 = scalar_lea.vmem %s1673_s11, 1024  ;;  %p1675_p0 = scmp.lt.s32.totalorder %s2006_s26, %s1673_s11 }
  0x66   : > { %p1670_p4 = pnand %p1668_p12, %p1941_p2  ;;  %p1676_p11 = scmp.lt.s32.totalorder %s1674_s17, %s1667_s24 }
  0x68   : > { %p1671_p10 = pneg %p1670_p4  ;;  %p1677_p1 = por %p1676_p11, %p1675_p0 }
  0x6a   : > { %p1678_p3 = pnand %p1677_p1, %p1671_p10 }
  0x6c   : > { %1681 = shalt.err (!%p1678_p3)
}
  0x6d   : > { %s2292_s6 = smov 8   ;;  %s2293_s1 = smov 128  }
  0x6e   : > { %1500 = dma.hbm_to_vmem [thread:$0]  (!%p2291_p13), %s2003_s14, 512, %s2006_s26, %s1935_s22, %s2293_s1, %s2293_s1, %s2292_s6  }
  0x6f   : > { %s2037_s12 = scalar_lea.hbm %s2265_s3, %s1924_s9  ;;  %s288_s10 = scalar_lea.vmem [#allocation11], %s1915_s7 }
  0x70   : > { %s298_s24 = sshll.u32 %s288_s10, 4  ;;  %s285_s19 = scalar_lea.sflag [#allocation12], %s1911_s5  ;;  %s2040_s24 = int_to_ptr.vmem [resolvable:$true] %s298_s24 }
  0x71   : > { %s1682_s11 = scalar_lea.hbm %s2037_s12, 512  ;;  %s1687_s26 = scalar_lea.hbm %s2265_s3, 1024 }
  0x72   : > { %p1683_p7 = scmp.ne.s32.totalorder %s2037_s12, %s1682_s11  ;;  %p1688_p8 = scmp.lt.u32.totalorder %s2037_s12, %s2265_s3 }
  0x73   : > { %p1689_p9 = scmp.lt.u32.totalorder %s1687_s26, %s1682_s11  ;;  %p1691_p4 = scmp.lt.u32.totalorder %s1682_s11, %s2037_s12 }
  0x74   : > { %p1685_p5 = pnand %p1683_p7, %p1941_p2 }
  0x75   : > { %p1690_p12 = por %p1689_p9, %p1688_p8 }
  0x76   : > { %p1686_p6 = pneg %p1685_p5 }
  0x77   : > { %p1692_p10 = por %p1691_p4, %p1690_p12 }
  0x79   : > { %p1693_p0 = pnand %p1692_p10, %p1686_p6 }
  0x7b   : > { %1696 = shalt.err (!%p1693_p0)
}
  0x7c   : > { %s1697_s7 = scalar_lea.vmem %s2040_s24, 512  ;;  %s1809_s29 = smov [#allocation11]  }
  0x7d   : > { %p1698_p11 = scmp.ne.s32.totalorder %s2040_s24, %s1697_s7  ;;  %s1702_s23 = sshll.u32 %s1809_s29, 4  ;;  %s1703_s23 = int_to_ptr.vmem [resolvable:$false] %s1702_s23 }
  0x7e   : > { %s1704_s10 = scalar_lea.vmem %s1703_s23, 1024  ;;  %p1705_p7 = scmp.lt.s32.totalorder %s2040_s24, %s1703_s23 }
  0x7f   : > { %p1700_p1 = pnand %p1698_p11, %p1941_p2  ;;  %p1706_p5 = scmp.lt.s32.totalorder %s1704_s10, %s1697_s7 }
  0x81   : > { %p1701_p3 = pneg %p1700_p1  ;;  %p1707_p8 = por %p1706_p5, %p1705_p7 }
  0x83   : > { %p1708_p9 = pnand %p1707_p8, %p1701_p3 }
  0x85   : > { %1711 = shalt.err (!%p1708_p9)
}
  0x86   : > { %1503 = dma.hbm_to_vmem [thread:$0]  (!%p2291_p13), %s2037_s12, 512, %s2040_s24, %s285_s19, %s2293_s1, %s2293_s1, %s2292_s6  }
  0x87   : > { %p2294_p2 = scmp.ne.s32.totalorder %s2290_s13, 0 }
  0x88   : > { %s2072_s25 = sand.u32 (!%p2294_p2), 1, %s1786_s16   ;;  %p2295_p6 = scmp.ne.s32.totalorder (!%p2294_p2), %s2283_s27, 0 }
  0x89   : > { %310 = sbr.rel (%p2294_p2) target bundleno = 980 (0x3d4), region = 36  ;;  %s313_s11 = scalar_lea.sflag (!%p2294_p2), [#allocation6], %s2072_s25 }
  0x8a   : > { %s315_s22 = scalar_lea.vmem (!%p2294_p2), [#allocation5], %s2072_s25 }
  0x90   : > { %1765 = dma.done.wait (%p2295_p6), %s313_s11, 16  }
  0x91   : > { %1767 = vsyncadd (%p2295_p6), %s313_s11, 4294967280  ;;  %s320_s5 = sand.u32 1, %s1873_s21   ;;  %s2082_s8 = sshll.u32 %s2072_s25, 5 }
  0x92   : > { %s321_s13 = scalar_lea.sflag [#allocation9], %s320_s5  ;;  %s2085_s6 = scalar_lea.vmem [#allocation8], %s2082_s8 }
  0x93   : > { %1769 = dma.done.wait (%p2295_p6), %s321_s13, 1024  }
  0x94   : > { %1771 = vsyncadd (%p2295_p6), %s321_s13, 4294966272  ;;  %s333_s1 = scalar_lea.vmem [#allocation10], %s2082_s8  ;;  %s339_s12 = scalar_lea.sflag [#allocation12], %s2072_s25 }
  0x95   : > { %s2094_s24 = scalar_lea.vmem [#allocation11], %s2082_s8 }
  0x96   : > { %1773 = dma.done.wait (%p2295_p6), %s339_s12, 512  }
  0x97   : > { %1775 = vsyncadd (%p2295_p6), %s339_s12, 4294966784  ;;  %vm398_vm0 = vcmask 261120   ;;  %v1810_v0 = vmov 0.0   ;;  %vm1811_vm1 = vmmov 0   ;;  %v411_v1 = vld [vmem:[%s333_s1] sm:$0xff]  ;;  %v412_v3 = vld [vmem:[%s333_s1 + $0x8] sm:$0xff] }
  0x98   : > { %1441 = vmatprep.subr.mxu0 %v1810_v0  ;;  %399 = vst.msk [vmem:[#allocation4] sm:$0xff] %vm398_vm0, %v1810_v0  ;;  %400 = vst.msk [vmem:[#allocation4 + $0x8] sm:$0xff] %vm398_vm0, %v1810_v0  ;;  %1443 = vmatprep.mubr.msk.f32.mxu0 %vm1811_vm1, %v1810_v0  ;;  %v403_v2 = vld [vmem:[%s2085_s6] sm:$0xff]  ;;  %v404_v5 = vld [vmem:[%s2085_s6 + $0x8] sm:$0xff]  ;;  %vm389_vm2 = vcmask 7168   ;;  %v1812_v13 = vmov -inf  }
  0x99   : > { %401 = vst.msk [vmem:[#allocation4 + $0x10] sm:$0xff] %vm398_vm0, %v1810_v0  ;;  %402 = vst.msk [vmem:[#allocation4 + $0x18] sm:$0xff] %vm398_vm0, %v1810_v0  ;;  %1446 = vmatprep.subr.mxu1 %v1810_v0  ;;  %1448 = vmatprep.mubr.msk.f32.mxu1 %vm1811_vm1, %v1810_v0  ;;  %v407_v4 = vmul.f32 0.17677669, %v403_v2  ;;  %v405_v6 = vld [vmem:[%s2085_s6 + $0x10] sm:$0xff]  ;;  %v406_v9 = vld [vmem:[%s2085_s6 + $0x18] sm:$0xff] }
  0x9a   : > { %1442 = vmatpush3.xpose.msk.msra.mxu0 %vm398_vm0, %v411_v1  ;;  %1447 = vmatpush3.xpose.msk.msra.mxu1 %vm398_vm0, %v412_v3  ;;  %v408_v7 = vmul.f32 0.17677669, %v404_v5  ;;  %v413_v8 = vld [vmem:[%s333_s1 + $0x10] sm:$0xff]  ;;  %v414_v10 = vld [vmem:[%s333_s1 + $0x18] sm:$0xff]  ;;  %v409_v11 = vmul.f32 0.17677669, %v405_v6 }
  0x9b   : > { %1451 = vmatprep.subr.mxu0 %v1810_v0  ;;  %1456 = vmatprep.subr.mxu1 %v1810_v0  ;;  %v410_v12 = vmul.f32 0.17677669, %v406_v9  ;;  %390 = vst.msk [vmem:[#allocation2] sm:$0xff] %vm389_vm2, %v1812_v13  ;;  %391 = vst.msk [vmem:[#allocation2 + $0x8] sm:$0xff] %vm389_vm2, %v1812_v13  ;;  %v1403_v14 = vld [vmem:[%s315_s22] ss:$0 sm:$0xff] }
  0x9c   : > { %392 = vst.msk [vmem:[#allocation2 + $0x10] sm:$0xff] %vm389_vm2, %v1812_v13  ;;  %393 = vst.msk [vmem:[#allocation2 + $0x18] sm:$0xff] %vm389_vm2, %v1812_v13  ;;  %vm731_vm3 = vcmask 64512   ;;  %v1813_v31 = vmov 0   ;;  %v821_v48 = vld [vmem:[%s2094_s24] sm:$0xff]  ;;  %v822_v49 = vld [vmem:[%s2094_s24 + $0x8] sm:$0xff] }
  0x9d   : > { %1444 = vmatmul.mubr.msk.f32.vlgmr.msra.gmra.mrb[0].mxu0 %vm398_vm0, %v407_v4  ;;  %1449 = vmatmul.mubr.msk.f32.vlgmr.msra.gmra.mrb[0].mxu1 %vm398_vm0, %v408_v7  ;;  %394 = vst.msk [vmem:[#allocation3] sm:$0xff] %vm389_vm2, %v1810_v0  ;;  %395 = vst.msk [vmem:[#allocation3 + $0x8] sm:$0xff] %vm389_vm2, %v1810_v0  ;;  %v823_v61 = vld [vmem:[%s2094_s24 + $0x10] sm:$0xff]  ;;  %v824_v2 = vld [vmem:[%s2094_s24 + $0x18] sm:$0xff]  ;;  %s380_s21 = scalar_lea.vmem [#allocation13], %s2082_s8  ;;  %s1424_s19 = sshll.u32 %s1794_s18, 9 }
  0x9e   : > { %1452 = vmatpush3.xpose.msk.msra.mxu0 %vm398_vm0, %v413_v8  ;;  %1453 = vmatprep.mubr.msk.f32.mxu0 %vm1811_vm1, %v1810_v0  ;;  %396 = vst.msk [vmem:[#allocation3 + $0x10] sm:$0xff] %vm389_vm2, %v1810_v0  ;;  %397 = vst.msk [vmem:[#allocation3 + $0x18] sm:$0xff] %vm389_vm2, %v1810_v0  ;;  %s1217_s27 = sshll.u32 %s380_s21, 4  ;;  %s2212_s9 = scalar_lea.hbm %s2266_s4, %s1424_s19  ;;  %s2206_s27 = int_to_ptr.vmem [resolvable:$true] %s1217_s27 }
  0x9f   : > { %1457 = vmatpush3.xpose.msk.msra.mxu1 %vm398_vm0, %v414_v10  ;;  %1458 = vmatprep.mubr.msk.f32.mxu1 %vm1811_vm1, %v1810_v0  ;;  %s1201_s17 = scalar_lea.sflag [#allocation7], %s2072_s25  ;;  %s1712_s7 = scalar_lea.vmem %s2206_s27, 512 }
  0xa0   : > { %1461 = vmatprep.subr.mxu0 %v1810_v0  ;;  %1466 = vmatprep.subr.mxu1 %v1810_v0  ;;  %p1713_p13 = scmp.ne.s32.totalorder %s2206_s27, %s1712_s7  ;;  %p2296_p12 = scmp.ne.s32.totalorder %s2284_s28, 0 }
  0xa1   : > { %1454 = vmatmul.mubr.msk.f32.vlgmr.msra.gmra.mrb[2].mxu0 %vm398_vm0, %v409_v11  ;;  %1566 = vset.pattern.permute.xlu0 %v1813_v31  ;;  %s1814_s18 = smov [#allocation13]  }
  0xa2   : > { %1459 = vmatmul.mubr.msk.f32.vlgmr.msra.gmra.mrb[2].mxu1 %vm398_vm0, %v410_v12  ;;  %1463 = vmatprep.mubr.msk.f32.mxu0 %vm1811_vm1, %v1810_v0  ;;  %v2156_v32 = vld [vmem:[#allocation2] sm:$0xff]  ;;  %v728_v35 = vld [vmem:[#allocation2 + $0x8] sm:$0xff]  ;;  %p1714_p4 = pnand %p1713_p13, %p2296_p12  ;;  %s1716_s29 = sshll.u32 %s1814_s18, 4  ;;  %s1717_s29 = int_to_ptr.vmem [resolvable:$false] %s1716_s29 }
  0xa3   : > { %1468 = vmatprep.mubr.msk.f32.mxu1 %vm1811_vm1, %v1810_v0  ;;  %1567 = vset.pattern.permute.xlu1 %v1813_v31  ;;  %v2161_v36 = vld [vmem:[#allocation2 + $0x10] sm:$0xff]  ;;  %v730_v42 = vld [vmem:[#allocation2 + $0x18] sm:$0xff]  ;;  %s1718_s23 = scalar_lea.vmem %s1717_s29, 1024  ;;  %p1719_p0 = scmp.lt.s32.totalorder %s2206_s27, %s1717_s29 }
  0xa4   : > { %1462 = vmatpush3.msra.mxu0 %v821_v48  ;;  %1467 = vmatpush3.msra.mxu1 %v822_v49  ;;  %p1715_p10 = pneg %p1714_p4  ;;  %p1720_p11 = scmp.lt.s32.totalorder %s1718_s23, %s1712_s7 }
  0xa5   : > { %1471 = vmatprep.subr.mxu0 %v1810_v0  ;;  %1476 = vmatprep.subr.mxu1 %v1810_v0 }
  0xa6   : > { %p1721_p1 = por %p1720_p11, %p1719_p0 }
  0xa8   : > { %p1722_p3 = pnand %p1721_p1, %p1715_p10 }
 0x170   : > { %v495_v15 = vpop.f32.mrb[0].mxu0  ;;  %v571_v16 = vpop.f32.mrb[0].mxu1 }
 0x171   : > { %v496_v17 = vadd.f32 %v1403_v14, %v495_v15  ;;  %v1445_v18 = vpop.f32.mrb[1].mxu0  ;;  %v572_v19 = vadd.f32 %v1403_v14, %v571_v16  ;;  %v1450_v20 = vpop.f32.mrb[1].mxu1  ;;  %v792_v16 = vld [vmem:[#allocation3] sm:$0xff] }
 0x173   : > { %v732_v21 = vsel %vm731_vm3, %v496_v17, -inf  ;;  %v735_v24 = vsel %vm731_vm3, %v572_v19, -inf }
 0x174   : > { %733 = vmax.xlane.f32.xlu0 %v732_v21  ;;  %v647_v22 = vpop.f32.mrb[2].mxu0 }
 0x175   : > { %v648_v23 = vadd.f32 %v1403_v14, %v647_v22  ;;  %v1455_v25 = vpop.f32.mrb[3].mxu0  ;;  %v723_v26 = vpop.f32.mrb[2].mxu1 }
 0x176   : > { %v724_v27 = vadd.f32 %v1403_v14, %v723_v26  ;;  %v1460_v28 = vpop.f32.mrb[3].mxu1 }
 0x177   : > { %v738_v29 = vsel %vm731_vm3, %v648_v23, -inf }
 0x178   : > { %736 = vmax.xlane.f32.xlu0 %v735_v24  ;;  %739 = vmax.xlane.f32.xlu1 %v738_v29  ;;  %v741_v30 = vsel %vm731_vm3, %v724_v27, -inf }
 0x17c   : > { %742 = vmax.xlane.f32.xlu1 %v741_v30 }
 0x201   : > { %v734_v33 = vpop.xlane.xlu0 %733 }
 0x202   : > { %v2159_v34 = vmax.f32 %v2156_v32, %v734_v33 }
 0x204   : > { %v748_v37 = vsub.f32 %v2156_v32, %v2159_v34  ;;  %1153 = vst.msk [vmem:[#allocation2] sm:$0xff] %vm389_vm2, %v2159_v34  ;;  %762 = vperm.xlu0 %1566, %v2159_v34  }
 0x205   : > { %v737_v38 = vpop.xlane.xlu0 %736  ;;  %v740_v39 = vpop.xlane.xlu1 %739 }
 0x206   : > { %v745_v40 = vmax.f32 %v728_v35, %v737_v38  ;;  %v746_v41 = vmax.f32 %v2161_v36, %v740_v39  ;;  %v752_v10 = vmul.f32 1.442695, %v748_v37 }
 0x208   : > { %v749_v43 = vsub.f32 %v728_v35, %v745_v40  ;;  %1154 = vst.msk [vmem:[#allocation2 + $0x8] sm:$0xff] %vm389_vm2, %v745_v40  ;;  %767 = vperm.xlu1 %1567, %v745_v40   ;;  %v750_v44 = vsub.f32 %v2161_v36, %v746_v41  ;;  %1155 = vst.msk [vmem:[#allocation2 + $0x10] sm:$0xff] %vm389_vm2, %v746_v41  ;;  %v1117_v40 = vld [vmem:[#allocation4] sm:$0xff] }
 0x209   : > { %v743_v45 = vpop.xlane.xlu1 %742 }
 0x20a   : > { %v747_v46 = vmax.f32 %v730_v42, %v743_v45  ;;  %v754_v8 = vmul.f32 1.442695, %v749_v43  ;;  %v1118_v43 = vld [vmem:[#allocation4 + $0x8] sm:$0xff] }
 0x20c   : > { %772 = vperm.xlu1 %1567, %v746_v41   ;;  %v751_v47 = vsub.f32 %v730_v42, %v747_v46  ;;  %1156 = vst.msk [vmem:[#allocation2 + $0x18] sm:$0xff] %vm389_vm2, %v747_v46 }
 0x20e   : > { %v758_v11 = vmul.f32 1.442695, %v751_v47 }
 0x210   : > { %777 = vperm.xlu1 %1567, %v747_v46  }
 0x283   : > { %v763_v50 = vpop.permute.xlu0 %762 }
 0x284   : > { %v780_v51 = vsub.f32 %v496_v17, %v763_v50  ;;  %v1119_v50 = vld [vmem:[#allocation4 + $0x10] sm:$0xff] }
 0x286   : > { %v784_v52 = vmul.f32 1.442695, %v780_v51 }
 0x287   : > { %v768_v53 = vpop.permute.xlu1 %767 }
 0x288   : > { %1568 = vpow2.f32 %v784_v52  ;;  %v781_v54 = vsub.f32 %v572_v19, %v768_v53  ;;  %v793_v19 = vld [vmem:[#allocation3 + $0x8] sm:$0xff] }
 0x28a   : > { %v786_v55 = vmul.f32 1.442695, %v781_v54 }
 0x28b   : > { %v773_v56 = vpop.permute.xlu1 %772 }
 0x28c   : > { %1570 = vpow2.f32 %v786_v55  ;;  %v782_v57 = vsub.f32 %v648_v23, %v773_v56  ;;  %v794_v23 = vld [vmem:[#allocation3 + $0x10] sm:$0xff]  ;;  %v1120_v55 = vld [vmem:[#allocation4 + $0x18] sm:$0xff] }
 0x28e   : > { %v788_v58 = vmul.f32 1.442695, %v782_v57 }
 0x28f   : > { %v778_v59 = vpop.permute.xlu1 %777 }
 0x290   : > { %1572 = vpow2.f32 %v788_v58  ;;  %v783_v60 = vsub.f32 %v724_v27, %v778_v59  ;;  %v795_v27 = vld [vmem:[#allocation3 + $0x18] sm:$0xff] }
 0x292   : > { %v1569_v62 = vpop.eup %1568  ;;  %v790_v63 = vmul.f32 1.442695, %v783_v60 }
 0x293   : > { %1464 = vmatmul.mubr.msk.f32.vlgmr.msra.gmra.mrb[4].mxu0 %vm731_vm3, %v1569_v62  ;;  %v800_v1 = vsel %vm731_vm3, %v1569_v62, 0.0 }
 0x294   : > { %1574 = vpow2.f32 %v790_v63  ;;  %801 = vadd.xlane.f32.xlu1 %v800_v1  ;;  %1472 = vmatpush3.msra.mxu0 %v823_v61 }
 0x295   : > { %1473 = vmatprep.mubr.msk.f32.mxu0 %vm1811_vm1, %v1810_v0  ;;  %1576 = vpow2.f32 %v754_v8 }
 0x296   : > { %v1571_v3 = vpop.eup %1570  ;;  %1578 = vpow2.f32 %v752_v10 }
 0x297   : > { %1469 = vmatmul.mubr.msk.f32.vlgmr.msra.gmra.mrb[4].mxu1 %vm731_vm3, %v1571_v3  ;;  %v803_v4 = vsel %vm731_vm3, %v1571_v3, 0.0 }
 0x298   : > { %804 = vadd.xlane.f32.xlu0 %v803_v4  ;;  %1477 = vmatpush3.msra.mxu1 %v824_v2 }
 0x299   : > { %1478 = vmatprep.mubr.msk.f32.mxu1 %vm1811_vm1, %v1810_v0  ;;  %v756_v0 = vmul.f32 1.442695, %v750_v44 }
 0x29a   : > { %v1573_v5 = vpop.eup %1572 }
 0x29b   : > { %1474 = vmatmul.mubr.msk.f32.vlgmr.msra.gmra.mrb[6].mxu0 %vm731_vm3, %v1573_v5  ;;  %v806_v6 = vsel %vm731_vm3, %v1573_v5, 0.0  ;;  %1580 = vpow2.f32 %v756_v0 }
 0x29c   : > { %807 = vadd.xlane.f32.xlu1 %v806_v6  ;;  %1582 = vpow2.f32 %v758_v11 }
 0x29e   : > { %v1575_v7 = vpop.eup %1574 }
 0x29f   : > { %1479 = vmatmul.mubr.msk.f32.vlgmr.msra.gmra.mrb[6].mxu1 %vm731_vm3, %v1575_v7  ;;  %v809_v9 = vsel %vm731_vm3, %v1575_v7, 0.0  ;;  %v1577_v12 = vpop.eup %1576 }
 0x2a0   : > { %810 = vadd.xlane.f32.xlu1 %v809_v9  ;;  %v1579_v13 = vpop.eup %1578  ;;  %v797_v21 = vmul.f32 %v1577_v12, %v793_v19 }
 0x2a1   : > { %v796_v17 = vmul.f32 %v1579_v13, %v792_v16 }
 0x2a5   : > { %v1581_v14 = vpop.eup %1580 }
 0x2a6   : > { %v1583_v15 = vpop.eup %1582  ;;  %v798_v25 = vmul.f32 %v1581_v14, %v794_v23 }
 0x2a7   : > { %v799_v30 = vmul.f32 %v1583_v15, %v795_v27 }
 0x2ae   : > { %1128 = vperm.xlu0 %1566, %v1577_v12  }
 0x2b1   : > { %1123 = vperm.xlu1 %1567, %v1579_v13  }
 0x2b5   : > { %1133 = vperm.xlu1 %1567, %v1581_v14  }
 0x2b9   : > { %1138 = vperm.xlu1 %1567, %v1583_v15  }
 0x321   : > { %v802_v18 = vpop.xlane.xlu1 %801 }
 0x322   : > { %v812_v20 = vadd.f32 %v802_v18, %v796_v17 }
 0x324   : > { %817 = vst.msk [vmem:[#allocation3] sm:$0xff] %vm389_vm2, %v812_v20 }
 0x325   : > { %v805_v22 = vpop.xlane.xlu0 %804 }
 0x326   : > { %v813_v24 = vadd.f32 %v805_v22, %v797_v21 }
 0x328   : > { %818 = vst.msk [vmem:[#allocation3 + $0x8] sm:$0xff] %vm389_vm2, %v813_v24 }
 0x329   : > { %v808_v26 = vpop.xlane.xlu1 %807 }
 0x32a   : > { %v814_v28 = vadd.f32 %v808_v26, %v798_v25 }
 0x32b   : > { %v1160_v29 = vld [vmem:[#allocation3] sm:$0xff] }
 0x32c   : > { %819 = vst.msk [vmem:[#allocation3 + $0x10] sm:$0xff] %vm389_vm2, %v814_v28  ;;  %1584 = vrcp.f32 %v1160_v29 }
 0x32d   : > { %v811_v31 = vpop.xlane.xlu1 %810  ;;  %v1129_v44 = vpop.permute.xlu0 %1128 }
 0x32e   : > { %v815_v32 = vadd.f32 %v811_v31, %v799_v30  ;;  %v1142_v49 = vmul.f32 %v1129_v44, %v1118_v43 }
 0x32f   : > { %v1161_v33 = vld [vmem:[#allocation3 + $0x8] sm:$0xff] }
 0x330   : > { %820 = vst.msk [vmem:[#allocation3 + $0x18] sm:$0xff] %vm389_vm2, %v815_v32  ;;  %1586 = vrcp.f32 %v1161_v33 }
 0x331   : > { %v1124_v41 = vpop.permute.xlu1 %1123 }
 0x332   : > { %v1141_v42 = vmul.f32 %v1124_v41, %v1117_v40 }
 0x333   : > { %v1162_v34 = vld [vmem:[#allocation3 + $0x10] sm:$0xff] }
 0x334   : > { %1588 = vrcp.f32 %v1162_v34 }
 0x335   : > { %v1134_v48 = vpop.permute.xlu1 %1133 }
 0x336   : > { %v1585_v35 = vpop.eup %1584  ;;  %v1143_v54 = vmul.f32 %v1134_v48, %v1119_v50 }
 0x337   : > { %1174 = vperm.xlu1 %1567, %v1585_v35   ;;  %v1163_v36 = vld [vmem:[#allocation3 + $0x18] sm:$0xff] }
 0x338   : > { %1590 = vrcp.f32 %v1163_v36 }
 0x339   : > { %v1139_v56 = vpop.permute.xlu1 %1138 }
 0x33a   : > { %v1587_v37 = vpop.eup %1586  ;;  %v1144_v60 = vmul.f32 %v1139_v56, %v1120_v55 }
 0x33b   : > { %1179 = vperm.xlu0 %1566, %v1587_v37  }
 0x33e   : > { %v1589_v38 = vpop.eup %1588 }
 0x33f   : > { %1184 = vperm.xlu1 %1567, %v1589_v38  }
 0x342   : > { %v1591_v39 = vpop.eup %1590 }
 0x343   : > { %1189 = vperm.xlu0 %1566, %v1591_v39  }
 0x366   : > { %v894_v45 = vpop.f32.mrb[4].mxu0 }
 0x367   : > { %v1145_v46 = vadd.f32 %v1141_v42, %v894_v45  ;;  %v1465_v47 = vpop.f32.mrb[5].mxu0 }
 0x369   : > { %1149 = vst.msk [vmem:[#allocation4] sm:$0xff] %vm398_vm0, %v1145_v46 }
 0x36a   : > { %v967_v51 = vpop.f32.mrb[4].mxu1 }
 0x36b   : > { %v1146_v52 = vadd.f32 %v1142_v49, %v967_v51  ;;  %v1470_v53 = vpop.f32.mrb[5].mxu1 }
 0x36d   : > { %1150 = vst.msk [vmem:[#allocation4 + $0x8] sm:$0xff] %vm398_vm0, %v1146_v52 }
 0x36e   : > { %v1040_v57 = vpop.f32.mrb[6].mxu0 }
 0x36f   : > { %v1147_v58 = vadd.f32 %v1143_v54, %v1040_v57  ;;  %v1475_v59 = vpop.f32.mrb[7].mxu0 }
 0x370   : > { %v1168_v1 = vld [vmem:[#allocation4] sm:$0xff] }
 0x371   : > { %1151 = vst.msk [vmem:[#allocation4 + $0x10] sm:$0xff] %vm398_vm0, %v1147_v58 }
 0x372   : > { %v1113_v61 = vpop.f32.mrb[6].mxu1 }
 0x373   : > { %v1148_v62 = vadd.f32 %v1144_v60, %v1113_v61  ;;  %v1480_v63 = vpop.f32.mrb[7].mxu1 }
 0x374   : > { %v1169_v4 = vld [vmem:[#allocation4 + $0x8] sm:$0xff] }
 0x375   : > { %1152 = vst.msk [vmem:[#allocation4 + $0x18] sm:$0xff] %vm398_vm0, %v1148_v62 }
 0x378   : > { %v1170_v7 = vld [vmem:[#allocation4 + $0x10] sm:$0xff] }
 0x37c   : > { %v1171_v0 = vld [vmem:[#allocation4 + $0x18] sm:$0xff] }
 0x3b6   : > { %v1175_v2 = vpop.permute.xlu1 %1174 }
 0x3b7   : > { %v1192_v3 = vmul.f32 %v1175_v2, %v1168_v1 }
 0x3b9   : > { %1196 = vst.msk [vmem:[%s380_s21] sm:$0xff] %vm398_vm0, %v1192_v3 }
 0x3ba   : > { %v1180_v5 = vpop.permute.xlu0 %1179 }
 0x3bb   : > { %v1193_v6 = vmul.f32 %v1180_v5, %v1169_v4 }
 0x3bd   : > { %1197 = vst.msk [vmem:[%s380_s21 + $0x8] sm:$0xff] %vm398_vm0, %v1193_v6 }
 0x3be   : > { %v1185_v8 = vpop.permute.xlu1 %1184 }
 0x3bf   : > { %v1194_v9 = vmul.f32 %v1185_v8, %v1170_v7 }
 0x3c1   : > { %1198 = vst.msk [vmem:[%s380_s21 + $0x10] sm:$0xff] %vm398_vm0, %v1194_v9 }
 0x3c2   : > { %v1190_v10 = vpop.permute.xlu0 %1189 }
 0x3c3   : > { %v1195_v11 = vmul.f32 %v1190_v10, %v1171_v0 }
 0x3c5   : > { %1199 = vst.msk [vmem:[%s380_s21 + $0x18] sm:$0xff] %vm398_vm0, %v1195_v11 }
 0x3c6   : > { %1725 = shalt.err (!%p1722_p3)
}
 0x3c7   : > { %s1726_s10 = scalar_lea.hbm %s2212_s9, 512  ;;  %s1730_s5 = scalar_lea.hbm %s2266_s4, 1024 }
 0x3c8   : > { %p1727_p7 = scmp.ne.s32.totalorder %s2212_s9, %s1726_s10  ;;  %p1731_p9 = scmp.lt.u32.totalorder %s2212_s9, %s2266_s4 }
 0x3c9   : > { %p1732_p2 = scmp.lt.u32.totalorder %s1730_s5, %s1726_s10  ;;  %p1734_p13 = scmp.lt.u32.totalorder %s1726_s10, %s2212_s9 }
 0x3ca   : > { %p1728_p5 = pnand %p1727_p7, %p2296_p12 }
 0x3cb   : > { %p1733_p6 = por %p1732_p2, %p1731_p9 }
 0x3cc   : > { %p1729_p8 = pneg %p1728_p5 }
 0x3cd   : > { %p1735_p4 = por %p1734_p13, %p1733_p6 }
 0x3cf   : > { %p1736_p10 = pnand %p1735_p4, %p1729_p8 }
 0x3d1   : > { %1739 = shalt.err (!%p1736_p10)
}
 0x3d2   : > { %s1815_s6 = smov 128   ;;  %s1816_s1 = smov 8  }
 0x3d3   : > { %1489 = dma.vmem_to_hbm [thread:$0]  (%p2296_p12), %s2206_s27, 512, %s2212_s9, %s1201_s17, %s1815_s6, %s1815_s6, %s1816_s1  }
 0x3d4 PF: > { %s1232_s12 = sand.u32 1, %s1782_s15   ;;  %p2297_p0 = scmp.ne.s32.totalorder %s2286_s30, 0 }
 0x3d5   : > { %p2298_p11 = scmp.ge.s32.totalorder %s1802_s20, 2  ;;  %s1233_s24 = scalar_lea.sflag [#allocation7], %s1232_s12 }
 0x3d7   : > { %p1505_p1 = pnand %p2298_p11, %p2297_p0 }
 0x3d9   : > { %1777 = dma.done.wait (!%p1505_p1), %s1233_s24, 512  }
 0x3da   : > { %1779 = vsyncadd (!%p1505_p1), %s1233_s24, 4294966784  ;;  %s26_s20 = sadd.s32 1, %s1802_s20   ;;  %s2299_s21 = sld [smem:[#allocation18_spill]] }
 0x3db   : > { %p23_p3 = scmp.ge.s32.totalorder %s26_s20, 4   ;;  %s2300_s17 = sld [smem:[#allocation21_spill]] }
 0x3dc   : > { %s2301_s18 = sld [smem:[#allocation19_spill]]  ;;  %s2302_s19 = sld [smem:[#allocation20_spill]] }
 0x3dd   : > { %s2303_s15 = smov %s1786_s16  ;;  %25 = sbr.rel (!%p23_p3) target bundleno = 12 (0xc), region = 126 }
 0x3e0   : > { %s2304_s16 = smov %s2299_s21 }
 0x3e4   :  { %1238 = vsyncpa [#allocation6], 1 }
 0x3e5   :  { %1240 = vsyncpa [#allocation6 + $0x1], 1 }
 0x3e6   :  { %1241 = vsyncpa [#allocation9], 1 }
 0x3e7   :  { %1243 = vsyncpa [#allocation9 + $0x1], 1 }
 0x3e8   :  { %1244 = vsyncpa [#allocation12], 1 }
 0x3e9   :  { %1246 = vsyncpa [#allocation12 + $0x1], 1 }
 0x3ea   :  { %1247 = vsyncpa [#allocation7], 1 }
 0x3eb   :  { %1249 = vsyncpa [#allocation7 + $0x1], 1 }

</bundles_post_ra>
